<compile_context>
chip_gen: v7x
topology: tpu7x:2x2x1
jax: 0.10.0
libtpu: 0.0.40
codegen_flags: <defaults>
</compile_context>

<pallas_src>
import jax
import jax.numpy as jnp
from jax.experimental import pallas as pl
from jax.experimental.pallas import tpu as pltpu


# ----------------------------------------------------------------------------
# Kernel: T GRU steps + output projection + log_softmax, weights resident.
# ----------------------------------------------------------------------------
def gru_seq_kernel(ids_ref,                                   # SMEM [T, Bp] int32 (scalar prefetch)
                   h0_ref, emb_ref,                           # [Bp,H] f32, [V,E] f32
                   w_ir_ref, w_iz_ref, w_in_ref,              # [E,H] bf16
                   w_hr_ref, w_hz_ref, w_hn_ref,              # [H,H] bf16
                   b_r_ref, b_z_ref, b_in_ref, b_hn_ref,      # [1,H] f32
                   w_out_ref, b_out_ref,                      # [H,Vp] bf16, [1,Vp] f32
                   logp_ref, hout_ref,                        # [Bp,Vp] f32, [Bp,H] f32
                   emb_scr):                                  # VMEM scratch [Bp,E] f32
    t = pl.program_id(0)
    Bp = hout_ref.shape[0]

    # hout_ref has a constant output block index across the whole grid, so it
    # stays resident in VMEM and carries the recurrent state between steps.
    @pl.when(t == 0)
    def _():
        hout_ref[...] = h0_ref[...]

    # Fused embedding gather: token ids from SMEM, rows from the VMEM table.
    for b in range(Bp):                               # static unroll (Bp small)
        tok = ids_ref[t, b]
        emb_scr[pl.ds(b, 1), :] = emb_ref[pl.ds(tok, 1), :]

    emb = emb_scr[...].astype(jnp.bfloat16)           # [Bp, E]
    h = hout_ref[...]                                 # [Bp, H] f32
    h_bf = h.astype(jnp.bfloat16)

    # Per-gate matmuls (bf16 operands, f32 accumulate); gate math in f32.
    r = jax.nn.sigmoid(
        jnp.dot(emb, w_ir_ref[...], preferred_element_type=jnp.float32)
        + jnp.dot(h_bf, w_hr_ref[...], preferred_element_type=jnp.float32)
        + b_r_ref[...])
    z = jax.nn.sigmoid(
        jnp.dot(emb, w_iz_ref[...], preferred_element_type=jnp.float32)
        + jnp.dot(h_bf, w_hz_ref[...], preferred_element_type=jnp.float32)
        + b_z_ref[...])
    gin = jnp.dot(emb, w_in_ref[...], preferred_element_type=jnp.float32) + b_in_ref[...]
    ghn = jnp.dot(h_bf, w_hn_ref[...], preferred_element_type=jnp.float32) + b_hn_ref[...]
    n = jnp.tanh(gin + r * ghn)
    h_new = (1.0 - z) * n + z * h
    hout_ref[...] = h_new

    # Output projection (bf16 MXU) + stable log_softmax over the (lane-dense,
    # padded) vocab axis.  Padded columns carry a -1e30 bias so they never win
    # the max and contribute ~0 to the exp-sum.
    logits = (jnp.dot(h_new.astype(jnp.bfloat16), w_out_ref[...],
                      preferred_element_type=jnp.float32) + b_out_ref[...])
    m = jnp.max(logits, axis=-1, keepdims=True)
    e = jnp.exp(logits - m)
    lse = jnp.log(jnp.sum(e, axis=-1, keepdims=True))
    logp_ref[...] = logits - m - lse


# ----------------------------------------------------------------------------
# Wrappers
# ----------------------------------------------------------------------------
def _round_up(n, m):
    return ((n + m - 1) // m) * m


def generator_unrolled_forward(kparams, inp_seq, hidden):
    """Run T GRU steps in ONE pallas_call (weights stay resident in VMEM).

    inp_seq : int32 [T, B] token ids
    hidden  : f32   [1, B, H]
    returns (log_probs [T, B, V], hidden' [1, B, H])
    """
    T, B = inp_seq.shape
    H = hidden.shape[-1]
    V = kparams["vocab_size"]
    E = kparams["embedding"].shape[1]
    Vp = kparams["w_out"].shape[1]
    Bp = max(_round_up(B, 8), 8)                      # sublane-dense batch

    ids = jnp.zeros((T, Bp), jnp.int32).at[:, :B].set(inp_seq.astype(jnp.int32))
    h0 = jnp.zeros((Bp, H), jnp.float32).at[:B].set(hidden[0].astype(jnp.float32))

    # Constant index_map => block DMA'd once, resident across all T steps.
    def const(shape):
        return pl.BlockSpec(shape, lambda t, ids_ref: (0,) * len(shape))

    in_specs = [
        const((Bp, H)),                         # h0
        const(kparams["embedding"].shape),      # embedding table
        const((E, H)), const((E, H)), const((E, H)),   # w_ir, w_iz, w_in
        const((H, H)), const((H, H)), const((H, H)),   # w_hr, w_hz, w_hn
        const((1, H)), const((1, H)), const((1, H)), const((1, H)),  # biases
        const((H, Vp)), const((1, Vp)),         # w_out, b_out
    ]
    out_specs = [
        pl.BlockSpec((None, Bp, Vp), lambda t, ids_ref: (t, 0, 0)),  # logp per step
        pl.BlockSpec((Bp, H), lambda t, ids_ref: (0, 0)),            # carried hidden
    ]

    logp, h_new = pl.pallas_call(
        gru_seq_kernel,
        out_shape=(jax.ShapeDtypeStruct((T, Bp, Vp), jnp.float32),
                   jax.ShapeDtypeStruct((Bp, H), jnp.float32)),
        grid_spec=pltpu.PrefetchScalarGridSpec(
            num_scalar_prefetch=1,
            grid=(T,),
            in_specs=in_specs,
            out_specs=out_specs,
            scratch_shapes=[pltpu.VMEM((Bp, E), jnp.float32)],
        ),
        compiler_params=pltpu.CompilerParams(
            dimension_semantics=("arbitrary",)),      # recurrent over time
    )(ids, h0, kparams["embedding"],
      kparams["w_ir"], kparams["w_iz"], kparams["w_in"],
      kparams["w_hr"], kparams["w_hz"], kparams["w_hn"],
      kparams["b_r"], kparams["b_z"], kparams["b_in"], kparams["b_hn"],
      kparams["w_out"], kparams["b_out"])

    return logp[:, :B, :V], h_new[:B][None]


def generator_forward(kparams, inp, hidden):
    """Mirrors Generator.forward(inp, hidden): a single GRU step."""
    logp_seq, h_new = generator_unrolled_forward(kparams, inp[None, :], hidden)
    return logp_seq[0], h_new


# ----------------------------------------------------------------------------
# Parameters: logical (torch-equivalent) init + kernel-layout packing.
# ----------------------------------------------------------------------------
def init_params(key, embedding_size, hidden_size, vocab_size):
    """Deterministic params matching the PyTorch module's shapes (f32)."""
    ks = jax.random.split(key, 7)
    k = 1.0 / jnp.sqrt(hidden_size)
    u = lambda kk, shape: jax.random.uniform(kk, shape, jnp.float32, -k, k)
    return {
        # nn.Embedding(vocab, emb): weight [V, E], N(0, 1)
        "embedding": jax.random.normal(ks[0], (vocab_size, embedding_size), jnp.float32),
        # nn.GRU(E, H): weight_ih [3H, E] stored transposed [E, 3H]; gate order r,z,n
        "w_ih": u(ks[1], (embedding_size, 3 * hidden_size)),
        "w_hh": u(ks[2], (hidden_size, 3 * hidden_size)),
        "b_ih": u(ks[3], (1, 3 * hidden_size)),
        "b_hh": u(ks[4], (1, 3 * hidden_size)),
        # nn.Linear(H, V): weight [V, H] stored transposed [H, V]
        "w_out": u(ks[5], (hidden_size, vocab_size)),
        "b_out": u(ks[6], (1, vocab_size)),
    }


def prepare_params(params, lane=128, neg=-1e30):
    """Pack params for the kernel: split gates, fold r/z biases, bf16 matmul
    weights, pad vocab to a lane-dense multiple of 128 (mask with -1e30 bias)."""
    E, H3 = params["w_ih"].shape
    H = H3 // 3
    V = params["w_out"].shape[1]
    Vp = max(_round_up(V, lane), lane)

    w_ih, w_hh = params["w_ih"], params["w_hh"]
    b_ih, b_hh = params["b_ih"][0], params["b_hh"][0]
    gate = lambda w, g: w[:, g * H:(g + 1) * H].astype(jnp.bfloat16)

    w_out = jnp.pad(params["w_out"], ((0, 0), (0, Vp - V)))
    b_out = jnp.pad(params["b_out"], ((0, 0), (0, Vp - V)), constant_values=neg)

    return {
        "vocab_size": V,
        # table kept f32: robust single-row dynamic gather (no packed sublanes)
        "embedding": params["embedding"].astype(jnp.float32),
        "w_ir": gate(w_ih, 0), "w_iz": gate(w_ih, 1), "w_in": gate(w_ih, 2),
        "w_hr": gate(w_hh, 0), "w_hz": gate(w_hh, 1), "w_hn": gate(w_hh, 2),
        "b_r": (b_ih[0:H] + b_hh[0:H]).reshape(1, H).astype(jnp.float32),
        "b_z": (b_ih[H:2 * H] + b_hh[H:2 * H]).reshape(1, H).astype(jnp.float32),
        "b_in": b_ih[2 * H:3 * H].reshape(1, H).astype(jnp.float32),
        "b_hn": b_hh[2 * H:3 * H].reshape(1, H).astype(jnp.float32),
        "w_out": w_out.astype(jnp.bfloat16),
        "b_out": b_out.astype(jnp.float32),    # padded lanes = -1e30
    }


# ----------------------------------------------------------------------------
# Pure-JAX f32 reference (correctness check only)
# ----------------------------------------------------------------------------
def ref_forward(params, inp, hidden):
    emb = jnp.take(params["embedding"], inp, axis=0)
    h = hidden[0]
    H = h.shape[-1]
    gi = emb @ params["w_ih"] + params["b_ih"]
    gh = h @ params["w_hh"] + params["b_hh"]
    r = jax.nn.sigmoid(gi[:, :H] + gh[:, :H])
    z = jax.nn.sigmoid(gi[:, H:2 * H] + gh[:, H:2 * H])
    n = jnp.tanh(gi[:, 2 * H:] + r * gh[:, 2 * H:])
    h_new = (1.0 - z) * n + z * h
    logits = h_new @ params["w_out"] + params["b_out"]
    return jax.nn.log_softmax(logits, axis=1), h_new[None]


if __name__ == "__main__":
    embedding_size = 32
    hidden_size = 32
    vocab_size = 16
    max_seq_len = 8
    batch = 4

    key = jax.random.PRNGKey(0)
    kp, ki, ks = jax.random.split(key, 3)
    params = init_params(kp, embedding_size, hidden_size, vocab_size)
    kparams = prepare_params(params)

    inp = jax.random.randint(ki, (batch,), 0, vocab_size, dtype=jnp.int32)
    hidden = jnp.zeros((1, batch, hidden_size), jnp.float32)   # init_hidden_layer

    # --- single step: Generator.forward ---------------------------------
    logp, h1 = generator_forward(kparams, inp, hidden)
    jax.block_until_ready((logp, h1))
    logp_ref, h1_ref = ref_forward(params, inp, hidden)
    assert logp.shape == (batch, vocab_size)
    assert h1.shape == (1, batch, hidden_size)
    # bf16 matmul operands (f32 accumulate) => relaxed tolerance vs f32 ref
    assert jnp.allclose(logp, logp_ref, atol=3e-2), "log-prob mismatch"
    assert jnp.allclose(h1, h1_ref, atol=3e-2), "hidden-state mismatch"

    # --- full sequence in one kernel launch (weights resident in VMEM) ---
    inp_seq = jax.random.randint(ks, (max_seq_len, batch), 0, vocab_size,
                                 dtype=jnp.int32)
    logp_seq, h_T = generator_unrolled_forward(kparams, inp_seq, hidden)
    jax.block_until_ready((logp_seq, h_T))

    h = hidden
    outs = []
    for t in range(max_seq_len):
        o, h = ref_forward(params, inp_seq[t], h)
        outs.append(o)
    logp_seq_ref = jnp.stack(outs)
    assert logp_seq.shape == (max_seq_len, batch, vocab_size)
    assert h_T.shape == (1, batch, hidden_size)
    assert jnp.allclose(logp_seq, logp_seq_ref, atol=3e-2), "seq log-prob mismatch"
    assert jnp.allclose(h_T, h, atol=3e-2), "seq hidden-state mismatch"

    print("KERNEL_OK")
</pallas_src>

<mosaic_0001>
module attributes {stable_mosaic.version = 11 : i64} {
  func.func @gru_seq_kernel(%arg0: i32, %arg1: memref<1x8xi32, #tpu.memory_space<smem>>, %arg2: memref<8x32xf32, #tpu.memory_space<vmem>>, %arg3: memref<16x32xf32, #tpu.memory_space<vmem>>, %arg4: memref<32x32xbf16, #tpu.memory_space<vmem>>, %arg5: memref<32x32xbf16, #tpu.memory_space<vmem>>, %arg6: memref<32x32xbf16, #tpu.memory_space<vmem>>, %arg7: memref<32x32xbf16, #tpu.memory_space<vmem>>, %arg8: memref<32x32xbf16, #tpu.memory_space<vmem>>, %arg9: memref<32x32xbf16, #tpu.memory_space<vmem>>, %arg10: memref<1x32xf32, #tpu.memory_space<vmem>>, %arg11: memref<1x32xf32, #tpu.memory_space<vmem>>, %arg12: memref<1x32xf32, #tpu.memory_space<vmem>>, %arg13: memref<1x32xf32, #tpu.memory_space<vmem>>, %arg14: memref<32x128xbf16, #tpu.memory_space<vmem>>, %arg15: memref<1x128xf32, #tpu.memory_space<vmem>>, %arg16: memref<1x8x128xf32, #tpu.memory_space<vmem>>, %arg17: memref<8x32xf32, #tpu.memory_space<vmem>>, %arg18: memref<8x32xf32, #tpu.memory_space<vmem>>) attributes {dimension_semantics = [#tpu.dimension_semantics<arbitrary>], iteration_bounds = array<i64: 1>, scalar_prefetch = 1 : i64, scratch_operands = 1 : i64, tpu.core_type = #tpu.core_type<tc>, window_params = [{pipeline_mode = #tpu.pipeline_mode<synchronous>, transform_indices = @transform_0, window_bounds = array<i64: 8, 32>}, {pipeline_mode = #tpu.pipeline_mode<synchronous>, transform_indices = @transform_1, window_bounds = array<i64: 16, 32>}, {pipeline_mode = #tpu.pipeline_mode<synchronous>, transform_indices = @transform_2, window_bounds = array<i64: 32, 32>}, {pipeline_mode = #tpu.pipeline_mode<synchronous>, transform_indices = @transform_3, window_bounds = array<i64: 32, 32>}, {pipeline_mode = #tpu.pipeline_mode<synchronous>, transform_indices = @transform_4, window_bounds = array<i64: 32, 32>}, {pipeline_mode = #tpu.pipeline_mode<synchronous>, transform_indices = @transform_5, window_bounds = array<i64: 32, 32>}, {pipeline_mode = #tpu.pipeline_mode<synchronous>, transform_indices = @transform_6, window_bounds = array<i64: 32, 32>}, {pipeline_mode = #tpu.pipeline_mode<synchronous>, transform_indices = @transform_7, window_bounds = array<i64: 32, 32>}, {pipeline_mode = #tpu.pipeline_mode<synchronous>, transform_indices = @transform_8, window_bounds = array<i64: 1, 32>}, {pipeline_mode = #tpu.pipeline_mode<synchronous>, transform_indices = @transform_9, window_bounds = array<i64: 1, 32>}, {pipeline_mode = #tpu.pipeline_mode<synchronous>, transform_indices = @transform_10, window_bounds = array<i64: 1, 32>}, {pipeline_mode = #tpu.pipeline_mode<synchronous>, transform_indices = @transform_11, window_bounds = array<i64: 1, 32>}, {pipeline_mode = #tpu.pipeline_mode<synchronous>, transform_indices = @transform_12, window_bounds = array<i64: 32, 128>}, {pipeline_mode = #tpu.pipeline_mode<synchronous>, transform_indices = @transform_13, window_bounds = array<i64: 1, 128>}, {transform_indices = @transform_14, window_bounds = array<i64: 1, 8, 128>}, {pipeline_mode = #tpu.pipeline_mode<synchronous>, transform_indices = @transform_15, window_bounds = array<i64: 8, 32>}]} {
    %c0_i32 = arith.constant 0 : i32
    %0 = arith.cmpi eq, %arg0, %c0_i32 : i32
    %1 = arith.extui %0 : i1 to i32
    %c0_i32_0 = arith.constant 0 : i32
    %2 = arith.cmpi ne, %1, %c0_i32_0 : i32
    scf.if %2 {
      %c0_69 = arith.constant 0 : index
      %c0_70 = arith.constant 0 : index
      %113 = vector.load %arg2[%c0_69, %c0_70] : memref<8x32xf32, #tpu.memory_space<vmem>>, vector<8x32xf32>
      %c0_71 = arith.constant 0 : index
      %c0_72 = arith.constant 0 : index
      %114 = vector.load %arg17[%c0_71, %c0_72] : memref<8x32xf32, #tpu.memory_space<vmem>>, vector<8x32xf32>
      tpu.vector_store %arg17[%c0_71, %c0_72], %113 {strides = array<i32>} : memref<8x32xf32, #tpu.memory_space<vmem>>, vector<8x32xf32>,
    } else {
    }
    %3 = arith.index_cast %arg0 : i32 to index
    %c0 = arith.constant 0 : index
    %4 = memref.load %arg1[%3, %c0] : memref<1x8xi32, #tpu.memory_space<smem>>
    %5 = arith.index_cast %4 : i32 to index
    %c0_1 = arith.constant 0 : index
    %6 = vector.load %arg3[%5, %c0_1] : memref<16x32xf32, #tpu.memory_space<vmem>>, vector<1x32xf32>
    %c0_2 = arith.constant 0 : index
    %c0_3 = arith.constant 0 : index
    %7 = vector.load %arg18[%c0_2, %c0_3] : memref<8x32xf32, #tpu.memory_space<vmem>>, vector<1x32xf32>
    tpu.vector_store %arg18[%c0_2, %c0_3], %6 {strides = array<i32>} : memref<8x32xf32, #tpu.memory_space<vmem>>, vector<1x32xf32>,
    %8 = arith.index_cast %arg0 : i32 to index
    %c1 = arith.constant 1 : index
    %9 = memref.load %arg1[%8, %c1] : memref<1x8xi32, #tpu.memory_space<smem>>
    %10 = arith.index_cast %9 : i32 to index
    %c0_4 = arith.constant 0 : index
    %11 = vector.load %arg3[%10, %c0_4] : memref<16x32xf32, #tpu.memory_space<vmem>>, vector<1x32xf32>
    %c1_5 = arith.constant 1 : index
    %c0_6 = arith.constant 0 : index
    %12 = vector.load %arg18[%c1_5, %c0_6] : memref<8x32xf32, #tpu.memory_space<vmem>>, vector<1x32xf32>
    tpu.vector_store %arg18[%c1_5, %c0_6], %11 {strides = array<i32>} : memref<8x32xf32, #tpu.memory_space<vmem>>, vector<1x32xf32>,
    %13 = arith.index_cast %arg0 : i32 to index
    %c2 = arith.constant 2 : index
    %14 = memref.load %arg1[%13, %c2] : memref<1x8xi32, #tpu.memory_space<smem>>
    %15 = arith.index_cast %14 : i32 to index
    %c0_7 = arith.constant 0 : index
    %16 = vector.load %arg3[%15, %c0_7] : memref<16x32xf32, #tpu.memory_space<vmem>>, vector<1x32xf32>
    %c2_8 = arith.constant 2 : index
    %c0_9 = arith.constant 0 : index
    %17 = vector.load %arg18[%c2_8, %c0_9] : memref<8x32xf32, #tpu.memory_space<vmem>>, vector<1x32xf32>
    tpu.vector_store %arg18[%c2_8, %c0_9], %16 {strides = array<i32>} : memref<8x32xf32, #tpu.memory_space<vmem>>, vector<1x32xf32>,
    %18 = arith.index_cast %arg0 : i32 to index
    %c3 = arith.constant 3 : index
    %19 = memref.load %arg1[%18, %c3] : memref<1x8xi32, #tpu.memory_space<smem>>
    %20 = arith.index_cast %19 : i32 to index
    %c0_10 = arith.constant 0 : index
    %21 = vector.load %arg3[%20, %c0_10] : memref<16x32xf32, #tpu.memory_space<vmem>>, vector<1x32xf32>
    %c3_11 = arith.constant 3 : index
    %c0_12 = arith.constant 0 : index
    %22 = vector.load %arg18[%c3_11, %c0_12] : memref<8x32xf32, #tpu.memory_space<vmem>>, vector<1x32xf32>
    tpu.vector_store %arg18[%c3_11, %c0_12], %21 {strides = array<i32>} : memref<8x32xf32, #tpu.memory_space<vmem>>, vector<1x32xf32>,
    %23 = arith.index_cast %arg0 : i32 to index
    %c4 = arith.constant 4 : index
    %24 = memref.load %arg1[%23, %c4] : memref<1x8xi32, #tpu.memory_space<smem>>
    %25 = arith.index_cast %24 : i32 to index
    %c0_13 = arith.constant 0 : index
    %26 = vector.load %arg3[%25, %c0_13] : memref<16x32xf32, #tpu.memory_space<vmem>>, vector<1x32xf32>
    %c4_14 = arith.constant 4 : index
    %c0_15 = arith.constant 0 : index
    %27 = vector.load %arg18[%c4_14, %c0_15] : memref<8x32xf32, #tpu.memory_space<vmem>>, vector<1x32xf32>
    tpu.vector_store %arg18[%c4_14, %c0_15], %26 {strides = array<i32>} : memref<8x32xf32, #tpu.memory_space<vmem>>, vector<1x32xf32>,
    %28 = arith.index_cast %arg0 : i32 to index
    %c5 = arith.constant 5 : index
    %29 = memref.load %arg1[%28, %c5] : memref<1x8xi32, #tpu.memory_space<smem>>
    %30 = arith.index_cast %29 : i32 to index
    %c0_16 = arith.constant 0 : index
    %31 = vector.load %arg3[%30, %c0_16] : memref<16x32xf32, #tpu.memory_space<vmem>>, vector<1x32xf32>
    %c5_17 = arith.constant 5 : index
    %c0_18 = arith.constant 0 : index
    %32 = vector.load %arg18[%c5_17, %c0_18] : memref<8x32xf32, #tpu.memory_space<vmem>>, vector<1x32xf32>
    tpu.vector_store %arg18[%c5_17, %c0_18], %31 {strides = array<i32>} : memref<8x32xf32, #tpu.memory_space<vmem>>, vector<1x32xf32>,
    %33 = arith.index_cast %arg0 : i32 to index
    %c6 = arith.constant 6 : index
    %34 = memref.load %arg1[%33, %c6] : memref<1x8xi32, #tpu.memory_space<smem>>
    %35 = arith.index_cast %34 : i32 to index
    %c0_19 = arith.constant 0 : index
    %36 = vector.load %arg3[%35, %c0_19] : memref<16x32xf32, #tpu.memory_space<vmem>>, vector<1x32xf32>
    %c6_20 = arith.constant 6 : index
    %c0_21 = arith.constant 0 : index
    %37 = vector.load %arg18[%c6_20, %c0_21] : memref<8x32xf32, #tpu.memory_space<vmem>>, vector<1x32xf32>
    tpu.vector_store %arg18[%c6_20, %c0_21], %36 {strides = array<i32>} : memref<8x32xf32, #tpu.memory_space<vmem>>, vector<1x32xf32>,
    %38 = arith.index_cast %arg0 : i32 to index
    %c7 = arith.constant 7 : index
    %39 = memref.load %arg1[%38, %c7] : memref<1x8xi32, #tpu.memory_space<smem>>
    %40 = arith.index_cast %39 : i32 to index
    %c0_22 = arith.constant 0 : index
    %41 = vector.load %arg3[%40, %c0_22] : memref<16x32xf32, #tpu.memory_space<vmem>>, vector<1x32xf32>
    %c7_23 = arith.constant 7 : index
    %c0_24 = arith.constant 0 : index
    %42 = vector.load %arg18[%c7_23, %c0_24] : memref<8x32xf32, #tpu.memory_space<vmem>>, vector<1x32xf32>
    tpu.vector_store %arg18[%c7_23, %c0_24], %41 {strides = array<i32>} : memref<8x32xf32, #tpu.memory_space<vmem>>, vector<1x32xf32>,
    %c0_25 = arith.constant 0 : index
    %c0_26 = arith.constant 0 : index
    %43 = vector.load %arg18[%c0_25, %c0_26] : memref<8x32xf32, #tpu.memory_space<vmem>>, vector<8x32xf32>
    %44 = arith.truncf %43 : vector<8x32xf32> to vector<8x32xbf16>
    %c0_27 = arith.constant 0 : index
    %c0_28 = arith.constant 0 : index
    %45 = vector.load %arg17[%c0_27, %c0_28] : memref<8x32xf32, #tpu.memory_space<vmem>>, vector<8x32xf32>
    %46 = arith.truncf %45 : vector<8x32xf32> to vector<8x32xbf16>
    %c0_29 = arith.constant 0 : index
    %c0_30 = arith.constant 0 : index
    %47 = vector.load %arg4[%c0_29, %c0_30] : memref<32x32xbf16, #tpu.memory_space<vmem>>, vector<32x32xbf16>
    %cst = arith.constant dense<0.000000e+00> : vector<8x32xf32>
    %48 = tpu.matmul %44, %47, %cst {dimension_numbers = #tpu.dot_dimension_numbers<[1], [0], [0], [1], [0, 0, 1, 1], [], []>} : vector<8x32xbf16>, vector<32x32xbf16>, vector<8x32xf32> -> vector<8x32xf32>
    %c0_31 = arith.constant 0 : index
    %c0_32 = arith.constant 0 : index
    %49 = vector.load %arg7[%c0_31, %c0_32] : memref<32x32xbf16, #tpu.memory_space<vmem>>, vector<32x32xbf16>
    %cst_33 = arith.constant dense<0.000000e+00> : vector<8x32xf32>
    %50 = tpu.matmul %46, %49, %cst_33 {dimension_numbers = #tpu.dot_dimension_numbers<[1], [0], [0], [1], [0, 0, 1, 1], [], []>} : vector<8x32xbf16>, vector<32x32xbf16>, vector<8x32xf32> -> vector<8x32xf32>
    %51 = arith.addf %48, %50 : vector<8x32xf32>
    %c0_34 = arith.constant 0 : index
    %c0_35 = arith.constant 0 : index
    %52 = vector.load %arg10[%c0_34, %c0_35] : memref<1x32xf32, #tpu.memory_space<vmem>>, vector<1x32xf32>
    %53 = vector.broadcast %52 : vector<1x32xf32> to vector<8x32xf32>
    %54 = arith.addf %51, %53 : vector<8x32xf32>
    %55 = arith.negf %54 : vector<8x32xf32>
    %56 = math.exp %55 : vector<8x32xf32>
    %cst_36 = arith.constant 1.000000e+00 : f32
    %57 = vector.broadcast %cst_36 : f32 to vector<8x32xf32>
    %58 = arith.addf %57, %56 : vector<8x32xf32>
    %59 = arith.divf %57, %58 : vector<8x32xf32>
    %c0_37 = arith.constant 0 : index
    %c0_38 = arith.constant 0 : index
    %60 = vector.load %arg5[%c0_37, %c0_38] : memref<32x32xbf16, #tpu.memory_space<vmem>>, vector<32x32xbf16>
    %cst_39 = arith.constant dense<0.000000e+00> : vector<8x32xf32>
    %61 = tpu.matmul %44, %60, %cst_39 {dimension_numbers = #tpu.dot_dimension_numbers<[1], [0], [0], [1], [0, 0, 1, 1], [], []>} : vector<8x32xbf16>, vector<32x32xbf16>, vector<8x32xf32> -> vector<8x32xf32>
    %c0_40 = arith.constant 0 : index
    %c0_41 = arith.constant 0 : index
    %62 = vector.load %arg8[%c0_40, %c0_41] : memref<32x32xbf16, #tpu.memory_space<vmem>>, vector<32x32xbf16>
    %cst_42 = arith.constant dense<0.000000e+00> : vector<8x32xf32>
    %63 = tpu.matmul %46, %62, %cst_42 {dimension_numbers = #tpu.dot_dimension_numbers<[1], [0], [0], [1], [0, 0, 1, 1], [], []>} : vector<8x32xbf16>, vector<32x32xbf16>, vector<8x32xf32> -> vector<8x32xf32>
    %64 = arith.addf %61, %63 : vector<8x32xf32>
    %c0_43 = arith.constant 0 : index
    %c0_44 = arith.constant 0 : index
    %65 = vector.load %arg11[%c0_43, %c0_44] : memref<1x32xf32, #tpu.memory_space<vmem>>, vector<1x32xf32>
    %66 = vector.broadcast %65 : vector<1x32xf32> to vector<8x32xf32>
    %67 = arith.addf %64, %66 : vector<8x32xf32>
    %68 = arith.negf %67 : vector<8x32xf32>
    %69 = math.exp %68 : vector<8x32xf32>
    %cst_45 = arith.constant 1.000000e+00 : f32
    %70 = vector.broadcast %cst_45 : f32 to vector<8x32xf32>
    %71 = arith.addf %70, %69 : vector<8x32xf32>
    %72 = arith.divf %70, %71 : vector<8x32xf32>
    %c0_46 = arith.constant 0 : index
    %c0_47 = arith.constant 0 : index
    %73 = vector.load %arg6[%c0_46, %c0_47] : memref<32x32xbf16, #tpu.memory_space<vmem>>, vector<32x32xbf16>
    %cst_48 = arith.constant dense<0.000000e+00> : vector<8x32xf32>
    %74 = tpu.matmul %44, %73, %cst_48 {dimension_numbers = #tpu.dot_dimension_numbers<[1], [0], [0], [1], [0, 0, 1, 1], [], []>} : vector<8x32xbf16>, vector<32x32xbf16>, vector<8x32xf32> -> vector<8x32xf32>
    %c0_49 = arith.constant 0 : index
    %c0_50 = arith.constant 0 : index
    %75 = vector.load %arg12[%c0_49, %c0_50] : memref<1x32xf32, #tpu.memory_space<vmem>>, vector<1x32xf32>
    %76 = vector.broadcast %75 : vector<1x32xf32> to vector<8x32xf32>
    %77 = arith.addf %74, %76 : vector<8x32xf32>
    %c0_51 = arith.constant 0 : index
    %c0_52 = arith.constant 0 : index
    %78 = vector.load %arg9[%c0_51, %c0_52] : memref<32x32xbf16, #tpu.memory_space<vmem>>, vector<32x32xbf16>
    %cst_53 = arith.constant dense<0.000000e+00> : vector<8x32xf32>
    %79 = tpu.matmul %46, %78, %cst_53 {dimension_numbers = #tpu.dot_dimension_numbers<[1], [0], [0], [1], [0, 0, 1, 1], [], []>} : vector<8x32xbf16>, vector<32x32xbf16>, vector<8x32xf32> -> vector<8x32xf32>
    %c0_54 = arith.constant 0 : index
    %c0_55 = arith.constant 0 : index
    %80 = vector.load %arg13[%c0_54, %c0_55] : memref<1x32xf32, #tpu.memory_space<vmem>>, vector<1x32xf32>
    %81 = vector.broadcast %80 : vector<1x32xf32> to vector<8x32xf32>
    %82 = arith.addf %79, %81 : vector<8x32xf32>
    %83 = arith.mulf %59, %82 : vector<8x32xf32>
    %84 = arith.addf %77, %83 : vector<8x32xf32>
    %85 = math.tanh %84 : vector<8x32xf32>
    %cst_56 = arith.constant 1.000000e+00 : f32
    %86 = vector.broadcast %cst_56 : f32 to vector<8x32xf32>
    %87 = arith.subf %86, %72 : vector<8x32xf32>
    %88 = arith.mulf %87, %85 : vector<8x32xf32>
    %89 = arith.mulf %72, %45 : vector<8x32xf32>
    %90 = arith.addf %88, %89 : vector<8x32xf32>
    %c0_57 = arith.constant 0 : index
    %c0_58 = arith.constant 0 : index
    %91 = vector.load %arg17[%c0_57, %c0_58] : memref<8x32xf32, #tpu.memory_space<vmem>>, vector<8x32xf32>
    tpu.vector_store %arg17[%c0_57, %c0_58], %90 {strides = array<i32>} : memref<8x32xf32, #tpu.memory_space<vmem>>, vector<8x32xf32>,
    %92 = arith.truncf %90 : vector<8x32xf32> to vector<8x32xbf16>
    %c0_59 = arith.constant 0 : index
    %c0_60 = arith.constant 0 : index
    %93 = vector.load %arg14[%c0_59, %c0_60] : memref<32x128xbf16, #tpu.memory_space<vmem>>, vector<32x128xbf16>
    %cst_61 = arith.constant dense<0.000000e+00> : vector<8x128xf32>
    %94 = tpu.matmul %92, %93, %cst_61 {dimension_numbers = #tpu.dot_dimension_numbers<[1], [0], [0], [1], [0, 0, 1, 1], [], []>} : vector<8x32xbf16>, vector<32x128xbf16>, vector<8x128xf32> -> vector<8x128xf32>
    %c0_62 = arith.constant 0 : index
    %c0_63 = arith.constant 0 : index
    %95 = vector.load %arg15[%c0_62, %c0_63] : memref<1x128xf32, #tpu.memory_space<vmem>>, vector<1x128xf32>
    %96 = vector.broadcast %95 : vector<1x128xf32> to vector<8x128xf32>
    %97 = arith.addf %94, %96 : vector<8x128xf32>
    %cst_64 = arith.constant dense<0xFF800000> : vector<8xf32>
    %98 = vector.multi_reduction <maximumf>, %97, %cst_64 [1] : vector<8x128xf32> to vector<8xf32>
    %99 = vector.shape_cast %98 : vector<8xf32> to vector<8x1xf32>
    %100 = vector.broadcast %99 : vector<8x1xf32> to vector<8x128xf32>
    %101 = arith.subf %97, %100 : vector<8x128xf32>
    %102 = math.exp %101 : vector<8x128xf32>
    %cst_65 = arith.constant dense<0.000000e+00> : vector<8xf32>
    %103 = vector.multi_reduction <add>, %102, %cst_65 [1] : vector<8x128xf32> to vector<8xf32>
    %104 = vector.shape_cast %103 : vector<8xf32> to vector<8x1xf32>
    %105 = math.log %104 : vector<8x1xf32>
    %106 = vector.broadcast %99 : vector<8x1xf32> to vector<8x128xf32>
    %107 = arith.subf %97, %106 : vector<8x128xf32>
    %108 = vector.broadcast %105 : vector<8x1xf32> to vector<8x128xf32>
    %109 = arith.subf %107, %108 : vector<8x128xf32>
    %c0_66 = arith.constant 0 : index
    %c0_67 = arith.constant 0 : index
    %c0_68 = arith.constant 0 : index
    %110 = vector.load %arg16[%c0_66, %c0_67, %c0_68] : memref<1x8x128xf32, #tpu.memory_space<vmem>>, vector<1x8x128xf32>
    %111 = vector.shape_cast %110 : vector<1x8x128xf32> to vector<8x128xf32>
    %112 = vector.shape_cast %109 : vector<8x128xf32> to vector<1x8x128xf32>
    tpu.vector_store %arg16[%c0_66, %c0_67, %c0_68], %112 {strides = array<i32>} : memref<1x8x128xf32, #tpu.memory_space<vmem>>, vector<1x8x128xf32>,
    return
  }
  func.func @transform_0(%arg0: i32, %arg1: memref<1x8xi32, #tpu.memory_space<smem>>) -> (i32, i32) {
    %c0_i32 = arith.constant 0 : i32
    %c0_i32_0 = arith.constant 0 : i32
    %c0_i32_1 = arith.constant 0 : i32
    return %c0_i32, %c0_i32_0 : i32, i32
  }
  func.func @transform_1(%arg0: i32, %arg1: memref<1x8xi32, #tpu.memory_space<smem>>) -> (i32, i32) {
    %c0_i32 = arith.constant 0 : i32
    %c0_i32_0 = arith.constant 0 : i32
    %c0_i32_1 = arith.constant 0 : i32
    return %c0_i32, %c0_i32_0 : i32, i32
  }
  func.func @transform_2(%arg0: i32, %arg1: memref<1x8xi32, #tpu.memory_space<smem>>) -> (i32, i32) {
    %c0_i32 = arith.constant 0 : i32
    %c0_i32_0 = arith.constant 0 : i32
    %c0_i32_1 = arith.constant 0 : i32
    return %c0_i32, %c0_i32_0 : i32, i32
  }
  func.func @transform_3(%arg0: i32, %arg1: memref<1x8xi32, #tpu.memory_space<smem>>) -> (i32, i32) {
    %c0_i32 = arith.constant 0 : i32
    %c0_i32_0 = arith.constant 0 : i32
    %c0_i32_1 = arith.constant 0 : i32
    return %c0_i32, %c0_i32_0 : i32, i32
  }
  func.func @transform_4(%arg0: i32, %arg1: memref<1x8xi32, #tpu.memory_space<smem>>) -> (i32, i32) {
    %c0_i32 = arith.constant 0 : i32
    %c0_i32_0 = arith.constant 0 : i32
    %c0_i32_1 = arith.constant 0 : i32
    return %c0_i32, %c0_i32_0 : i32, i32
  }
  func.func @transform_5(%arg0: i32, %arg1: memref<1x8xi32, #tpu.memory_space<smem>>) -> (i32, i32) {
    %c0_i32 = arith.constant 0 : i32
    %c0_i32_0 = arith.constant 0 : i32
    %c0_i32_1 = arith.constant 0 : i32
    return %c0_i32, %c0_i32_0 : i32, i32
  }
  func.func @transform_6(%arg0: i32, %arg1: memref<1x8xi32, #tpu.memory_space<smem>>) -> (i32, i32) {
    %c0_i32 = arith.constant 0 : i32
    %c0_i32_0 = arith.constant 0 : i32
    %c0_i32_1 = arith.constant 0 : i32
    return %c0_i32, %c0_i32_0 : i32, i32
  }
  func.func @transform_7(%arg0: i32, %arg1: memref<1x8xi32, #tpu.memory_space<smem>>) -> (i32, i32) {
    %c0_i32 = arith.constant 0 : i32
    %c0_i32_0 = arith.constant 0 : i32
    %c0_i32_1 = arith.constant 0 : i32
    return %c0_i32, %c0_i32_0 : i32, i32
  }
  func.func @transform_8(%arg0: i32, %arg1: memref<1x8xi32, #tpu.memory_space<smem>>) -> (i32, i32) {
    %c0_i32 = arith.constant 0 : i32
    %c0_i32_0 = arith.constant 0 : i32
    %c0_i32_1 = arith.constant 0 : i32
    return %c0_i32, %c0_i32_0 : i32, i32
  }
  func.func @transform_9(%arg0: i32, %arg1: memref<1x8xi32, #tpu.memory_space<smem>>) -> (i32, i32) {
    %c0_i32 = arith.constant 0 : i32
    %c0_i32_0 = arith.constant 0 : i32
    %c0_i32_1 = arith.constant 0 : i32
    return %c0_i32, %c0_i32_0 : i32, i32
  }
  func.func @transform_10(%arg0: i32, %arg1: memref<1x8xi32, #tpu.memory_space<smem>>) -> (i32, i32) {
    %c0_i32 = arith.constant 0 : i32
    %c0_i32_0 = arith.constant 0 : i32
    %c0_i32_1 = arith.constant 0 : i32
    return %c0_i32, %c0_i32_0 : i32, i32
  }
  func.func @transform_11(%arg0: i32, %arg1: memref<1x8xi32, #tpu.memory_space<smem>>) -> (i32, i32) {
    %c0_i32 = arith.constant 0 : i32
    %c0_i32_0 = arith.constant 0 : i32
    %c0_i32_1 = arith.constant 0 : i32
    return %c0_i32, %c0_i32_0 : i32, i32
  }
  func.func @transform_12(%arg0: i32, %arg1: memref<1x8xi32, #tpu.memory_space<smem>>) -> (i32, i32) {
    %c0_i32 = arith.constant 0 : i32
    %c0_i32_0 = arith.constant 0 : i32
    %c0_i32_1 = arith.constant 0 : i32
    return %c0_i32, %c0_i32_0 : i32, i32
  }
  func.func @transform_13(%arg0: i32, %arg1: memref<1x8xi32, #tpu.memory_space<smem>>) -> (i32, i32) {
    %c0_i32 = arith.constant 0 : i32
    %c0_i32_0 = arith.constant 0 : i32
    %c0_i32_1 = arith.constant 0 : i32
    return %c0_i32, %c0_i32_0 : i32, i32
  }
  func.func @transform_14(%arg0: i32, %arg1: memref<1x8xi32, #tpu.memory_space<smem>>) -> (i32, i32, i32) {
    %c0_i32 = arith.constant 0 : i32
    %c0_i32_0 = arith.constant 0 : i32
    %c0_i32_1 = arith.constant 0 : i32
    return %arg0, %c0_i32, %c0_i32_0 : i32, i32, i32
  }
  func.func @transform_15(%arg0: i32, %arg1: memref<1x8xi32, #tpu.memory_space<smem>>) -> (i32, i32) {
    %c0_i32 = arith.constant 0 : i32
    %c0_i32_0 = arith.constant 0 : i32
    %c0_i32_1 = arith.constant 0 : i32
    return %c0_i32, %c0_i32_0 : i32, i32
  }
}

</mosaic_0001>

<bundles_post_ra>
// kernel: tpu_custom_call.1
= control target key start
LH: loop header
LB: loop body
LE: loop exit
PB: predicated region body
PF: predicated region fallthrough
CT: control target
= control target key end

     0   :  { %s1413_s0 = inlined_call_operand.hbm [shape: s32[1,8], index: 0, kind: input, shape index: {}]   ;;  %s1414_s1 = inlined_call_operand.hbm [shape: f32[8,32], index: 1, kind: input, shape index: {}]   ;;  %s1415_s2 = inlined_call_operand.hbm [shape: f32[16,32], index: 2, kind: input, shape index: {}]   ;;  %s1416_s3 = inlined_call_operand.hbm [shape: bf16[32,32], index: 3, kind: input, shape index: {}]   ;;  %s1417_s4 = inlined_call_operand.hbm [shape: bf16[32,32], index: 4, kind: input, shape index: {}]   ;;  %s1418_s5 = inlined_call_operand.vmem [shape: bf16[32,32], index: 5, kind: input, shape index: {}]   ;;  %s1419_s6 = inlined_call_operand.hbm [shape: bf16[32,32], index: 6, kind: input, shape index: {}]   ;;  %s1420_s7 = inlined_call_operand.hbm [shape: bf16[32,32], index: 7, kind: input, shape index: {}]   ;;  %s1421_s8 = inlined_call_operand.hbm [shape: bf16[32,32], index: 8, kind: input, shape index: {}]   ;;  %s1422_s9 = inlined_call_operand.vmem [shape: f32[1,32], index: 9, kind: input, shape index: {}]   ;;  %s1423_s10 = inlined_call_operand.vmem [shape: f32[1,32], index: 10, kind: input, shape index: {}]   ;;  %s1424_s11 = inlined_call_operand.vmem [shape: f32[1,32], index: 11, kind: input, shape index: {}]   ;;  %s1425_s12 = inlined_call_operand.vmem [shape: f32[1,32], index: 12, kind: input, shape index: {}]   ;;  %s1426_s13 = inlined_call_operand.vmem [shape: bf16[32,128], index: 13, kind: input, shape index: {}]   ;;  %s1427_s14 = inlined_call_operand.vmem [shape: f32[1,128], index: 14, kind: input, shape index: {}]   ;;  %s1428_s15 = inlined_call_operand.hbm [shape: f32[1,8,128], index: 15, kind: output, shape index: {0}]   ;;  %s1429_s16 = inlined_call_operand.hbm [shape: f32[8,32], index: 16, kind: output, shape index: {1}]  }
   0x1   :  { %1431 = sst [smem:[#allocation27_spill]] %s1413_s0 }
   0x2   :  { %1432 = sst [smem:[#allocation28_spill]] %s1423_s10  ;;  %s1433_s23 = sld [smem:[#allocation27_spill]] }
   0x8   :  { %s869_s10 = scalar_lea.hbm %s1433_s23, 16 }
   0x9   :  { %p870_p0 = scmp.ne.s32.totalorder %s1433_s23, %s869_s10  ;;  %p873_p1 = scmp.lt.u32.totalorder %s869_s10, %s1433_s23 }
   0xb   :  { %p875_p2 = pnand %p873_p1, %p870_p0 }
   0xd   :  { %878 = shalt.err (!%p875_p2)  }
   0xe   :  { %s1091_s28 = smov [#allocation4]  }
   0xf   :  { %23 = dma.hbm_to_smem %s1433_s23, 16, %s1091_s28, [#allocation3] }
  0x10   :  { %1077 = dma.done.wait [#allocation3], 16 }
  0x11   :  { %1078 = vsyncadd [#allocation3], 4294967280 }
  0x12   :  { %25 = sfence }
  0x13   :  { %26 = vsyncpa [#allocation6], 0 }
  0x14   :  { %27 = vsyncpa [#allocation9], 0 }
  0x15   :  { %28 = vsyncpa [#allocation12], 0 }
  0x16   :  { %29 = vsyncpa [#allocation15], 0 }
  0x17   :  { %30 = vsyncpa [#allocation7], 0 }
  0x18   :  { %31 = vsyncpa [#allocation19], 0  ;;  %s1092_s0 = smov [#allocation8]   ;;  %s879_s19 = scalar_lea.hbm %s1415_s2, 256 }
  0x19   :  { %s47_s17 = sshll.u32 %s1092_s0, 4  ;;  %p880_p3 = scmp.ne.s32.totalorder %s1415_s2, %s879_s19  ;;  %s48_s17 = int_to_ptr.vmem [resolvable:$true] %s47_s17 }
  0x1a   :  { %p883_p4 = scmp.lt.u32.totalorder %s879_s19, %s1415_s2 }
  0x1c   :  { %p885_p5 = pnand %p883_p4, %p880_p3 }
  0x1e   :  { %888 = shalt.err (!%p885_p5)
}
  0x1f   :  { %s889_s24 = scalar_lea.vmem %s48_s17, 256  ;;  %p894_p7 = scmp.lt.s32.totalorder %s48_s17, %s48_s17 }
  0x20   :  { %p890_p6 = scmp.ne.s32.totalorder %s48_s17, %s889_s24  ;;  %p895_p8 = scmp.lt.s32.totalorder %s889_s24, %s889_s24 }
  0x22   :  { %p896_p9 = por %p895_p8, %p894_p7 }
  0x24   :  { %p897_p10 = pnand %p896_p9, %p890_p6 }
  0x26   :  { %900 = shalt.err (!%p897_p10)
}
  0x27   :  { %s1093_s25 = smov 128   ;;  %s1094_s26 = smov 8  }
  0x28   :  { %53 = dma.hbm_to_vmem [thread:$0]  %s1415_s2, 256, %s48_s17, [#allocation9], %s1093_s25, %s1093_s25, %s1094_s26  }
  0x29   :  { %s1095_s29 = smov [#allocation11]   ;;  %s1096_s0 = smov [#allocation14]  }
  0x2a   :  { %s71_s30 = sshll.u32 %s1095_s29, 4  ;;  %s97_s10 = sshll.u32 %s1096_s0, 4  ;;  %s72_s30 = int_to_ptr.vmem [resolvable:$true] %s71_s30  ;;  %s98_s10 = int_to_ptr.vmem [resolvable:$true] %s97_s10 }
  0x2b   :  { %s901_s20 = scalar_lea.hbm %s1417_s4, 256 }
  0x2c   :  { %p902_p11 = scmp.ne.s32.totalorder %s1417_s4, %s901_s20  ;;  %p905_p12 = scmp.lt.u32.totalorder %s901_s20, %s1417_s4 }
  0x2e   :  { %p907_p13 = pnand %p905_p12, %p902_p11 }
  0x30   :  { %910 = shalt.err (!%p907_p13)
}
  0x31   :  { %s911_s2 = scalar_lea.vmem %s72_s30, 256  ;;  %p916_p1 = scmp.lt.s32.totalorder %s72_s30, %s72_s30 }
  0x32   :  { %p912_p0 = scmp.ne.s32.totalorder %s72_s30, %s911_s2  ;;  %p917_p2 = scmp.lt.s32.totalorder %s911_s2, %s911_s2 }
  0x34   :  { %p918_p3 = por %p917_p2, %p916_p1 }
  0x36   :  { %p919_p4 = pnand %p918_p3, %p912_p0 }
  0x38   :  { %922 = shalt.err (!%p919_p4)
}
  0x39   :  { %s1097_s17 = smov 64   ;;  %s1098_s25 = smov 4  }
  0x3a   :  { %77 = dma.hbm_to_vmem [thread:$0]  %s1417_s4, 256, %s72_s30, [#allocation12], %s1097_s17, %s1097_s17, %s1098_s25  }
  0x3b   :  { %s923_s0 = scalar_lea.hbm %s1420_s7, 256 }
  0x3c   :  { %p924_p5 = scmp.ne.s32.totalorder %s1420_s7, %s923_s0  ;;  %p927_p6 = scmp.lt.u32.totalorder %s923_s0, %s1420_s7 }
  0x3e   :  { %p929_p7 = pnand %p927_p6, %p924_p5 }
  0x40   :  { %932 = shalt.err (!%p929_p7)
}
  0x41   :  { %s933_s22 = scalar_lea.vmem %s98_s10, 256  ;;  %p938_p9 = scmp.lt.s32.totalorder %s98_s10, %s98_s10 }
  0x42   :  { %p934_p8 = scmp.ne.s32.totalorder %s98_s10, %s933_s22  ;;  %p939_p10 = scmp.lt.s32.totalorder %s933_s22, %s933_s22 }
  0x44   :  { %p940_p11 = por %p939_p10, %p938_p9 }
  0x46   :  { %p941_p12 = pnand %p940_p11, %p934_p8 }
  0x48   :  { %944 = shalt.err (!%p941_p12)
}
  0x49   :  { %103 = dma.hbm_to_vmem [thread:$0]  %s1420_s7, 256, %s98_s10, [#allocation15], %s1097_s17, %s1097_s17, %s1098_s25  }
  0x4a   :  { %s1099_s23 = smov [#allocation5]   ;;  %s1100_s2 = smov [#allocation10]  }
  0x4b   :  { %s38_s24 = sshll.u32 %s1099_s23, 4  ;;  %s59_s26 = sshll.u32 %s1100_s2, 4  ;;  %s39_s24 = int_to_ptr.vmem [resolvable:$true] %s38_s24  ;;  %s60_s26 = int_to_ptr.vmem [resolvable:$true] %s59_s26 }
  0x4c   :  { %s945_s29 = scalar_lea.hbm %s1414_s1, 128 }
  0x4d   :  { %p946_p13 = scmp.ne.s32.totalorder %s1414_s1, %s945_s29  ;;  %p949_p0 = scmp.lt.u32.totalorder %s945_s29, %s1414_s1 }
  0x4f   :  { %p951_p1 = pnand %p949_p0, %p946_p13 }
  0x51   :  { %954 = shalt.err (!%p951_p1)
}
  0x52   :  { %s955_s7 = scalar_lea.vmem %s39_s24, 128  ;;  %p960_p3 = scmp.lt.s32.totalorder %s39_s24, %s39_s24 }
  0x53   :  { %p956_p2 = scmp.ne.s32.totalorder %s39_s24, %s955_s7  ;;  %p961_p4 = scmp.lt.s32.totalorder %s955_s7, %s955_s7 }
  0x55   :  { %p962_p5 = por %p961_p4, %p960_p3 }
  0x57   :  { %p963_p6 = pnand %p962_p5, %p956_p2 }
  0x59   :  { %966 = shalt.err (!%p963_p6)
}
  0x5a   :  { %41 = dma.hbm_to_vmem [thread:$0]  %s1414_s1, 128, %s39_s24, [#allocation6]  }
  0x5b   :  { %s967_s30 = scalar_lea.hbm %s1416_s3, 256 }
  0x5c   :  { %p968_p7 = scmp.ne.s32.totalorder %s1416_s3, %s967_s30  ;;  %p971_p8 = scmp.lt.u32.totalorder %s967_s30, %s1416_s3 }
  0x5e   :  { %p973_p9 = pnand %p971_p8, %p968_p7 }
  0x60   :  { %976 = shalt.err (!%p973_p9)
}
  0x61   :  { %s977_s29 = scalar_lea.vmem %s60_s26, 256  ;;  %p982_p11 = scmp.lt.s32.totalorder %s60_s26, %s60_s26 }
  0x62   :  { %p978_p10 = scmp.ne.s32.totalorder %s60_s26, %s977_s29  ;;  %p983_p12 = scmp.lt.s32.totalorder %s977_s29, %s977_s29 }
  0x64   :  { %p984_p13 = por %p983_p12, %p982_p11 }
  0x66   :  { %p985_p0 = pnand %p984_p13, %p978_p10 }
  0x68   :  { %988 = shalt.err (!%p985_p0)
}
  0x69   :  { %65 = dma.hbm_to_vmem [thread:$0]  %s1416_s3, 256, %s60_s26, [#allocation9], %s1097_s17, %s1097_s17, %s1098_s25  }
  0x6a   :  { %s1101_s0 = smov [#allocation13]   ;;  %s1102_s19 = smov [#allocation16]  }
  0x6b   :  { %s85_s18 = sshll.u32 %s1101_s0, 4  ;;  %s109_s20 = sshll.u32 %s1102_s19, 4  ;;  %s86_s18 = int_to_ptr.vmem [resolvable:$true] %s85_s18  ;;  %s110_s20 = int_to_ptr.vmem [resolvable:$true] %s109_s20 }
  0x6c   :  { %s989_s21 = scalar_lea.hbm %s1419_s6, 256 }
  0x6d   :  { %p990_p1 = scmp.ne.s32.totalorder %s1419_s6, %s989_s21  ;;  %p993_p2 = scmp.lt.u32.totalorder %s989_s21, %s1419_s6 }
  0x6f   :  { %p995_p3 = pnand %p993_p2, %p990_p1 }
  0x71   :  { %998 = shalt.err (!%p995_p3)
}
  0x72   :  { %s999_s3 = scalar_lea.vmem %s86_s18, 256  ;;  %p1004_p5 = scmp.lt.s32.totalorder %s86_s18, %s86_s18 }
  0x73   :  { %p1000_p4 = scmp.ne.s32.totalorder %s86_s18, %s999_s3  ;;  %p1005_p6 = scmp.lt.s32.totalorder %s999_s3, %s999_s3 }
  0x75   :  { %p1006_p7 = por %p1005_p6, %p1004_p5 }
  0x77   :  { %p1007_p8 = pnand %p1006_p7, %p1000_p4 }
  0x79   :  { %1010 = shalt.err (!%p1007_p8)
}
  0x7a   :  { %91 = dma.hbm_to_vmem [thread:$0]  %s1419_s6, 256, %s86_s18, [#allocation12], %s1097_s17, %s1097_s17, %s1098_s25  }
  0x7b   :  { %s1011_s29 = scalar_lea.hbm %s1421_s8, 256 }
  0x7c   :  { %p1012_p9 = scmp.ne.s32.totalorder %s1421_s8, %s1011_s29  ;;  %p1015_p10 = scmp.lt.u32.totalorder %s1011_s29, %s1421_s8 }
  0x7e   :  { %p1017_p11 = pnand %p1015_p10, %p1012_p9 }
  0x80   :  { %1020 = shalt.err (!%p1017_p11)
}
  0x81   :  { %s1021_s7 = scalar_lea.vmem %s110_s20, 256  ;;  %p1026_p13 = scmp.lt.s32.totalorder %s110_s20, %s110_s20 }
  0x82   :  { %p1022_p12 = scmp.ne.s32.totalorder %s110_s20, %s1021_s7  ;;  %p1027_p0 = scmp.lt.s32.totalorder %s1021_s7, %s1021_s7 }
  0x84   :  { %p1028_p1 = por %p1027_p0, %p1026_p13 }
  0x86   :  { %p1029_p2 = pnand %p1028_p1, %p1022_p12 }
  0x88   :  { %1032 = shalt.err (!%p1029_p2)
}
  0x89   :  { %115 = dma.hbm_to_vmem [thread:$0]  %s1421_s8, 256, %s110_s20, [#allocation15], %s1097_s17, %s1097_s17, %s1098_s25  }
  0x8a   :  { %1079 = dma.done.wait [#allocation6], 128  }
  0x8b   :  { %1080 = vsyncadd [#allocation6], 4294967168 }
  0x8c   :  { %1081 = dma.done.wait [#allocation9], 512  }
  0x8d   :  { %1082 = vsyncadd [#allocation9], 4294966784 }
  0x8e   :  { %1083 = dma.done.wait [#allocation12], 512  }
  0x8f   :  { %1084 = vsyncadd [#allocation12], 4294966784 }
  0x90   :  { %1085 = dma.done.wait [#allocation15], 512  }
  0x91   :  { %1086 = vsyncadd [#allocation15], 4294966784  ;;  %v1103_v0 = vmov 0.0   ;;  %s158_s10 = sld [smem:[#allocation4]]  ;;  %s713_s21 = sld [smem:[#allocation4 + $0x1]]  ;;  %vm1104_vm0 = vmmov 0  }
  0x92   :  { %769 = vmatprep.subr.bf16.mxu0 %v1103_v0  ;;  %777 = vmatprep.subr.bf16.mxu1 %v1103_v0  ;;  %s714_s8 = sld [smem:[#allocation4 + $0x2]]  ;;  %s715_s17 = sld [smem:[#allocation4 + $0x3]]  ;;  %vm155_vm1 = vcmask 261120   ;;  %vm161_vm2 = vcmask 253952   ;;  %v841_v1 = vld [vmem:[#allocation13] sm:$0xff]   ;;  %v843_v3 = vld [vmem:[#allocation13 + $0x8] sm:$0xff]  }
  0x93   :  { %773 = vmatprep.mubr.msk.bf16.mxu0 %vm1104_vm0, %v1103_v0  ;;  %781 = vmatprep.mubr.msk.bf16.mxu1 %vm1104_vm0, %v1103_v0  ;;  %s716_s25 = sld [smem:[#allocation4 + $0x4]]  ;;  %s1309_s20 = sld [smem:[#allocation4 + $0x5]]  ;;  %v842_v2 = vld [vmem:[#allocation10] sm:$0xff]   ;;  %v844_v4 = vld [vmem:[#allocation10 + $0x8] sm:$0xff]   ;;  %v845_v15 = vld [vmem:[#allocation14] sm:$0xff]  }
  0x94   :  { %s1311_s22 = sld [smem:[#allocation4 + $0x6]]  ;;  %s1313_s4 = sld [smem:[#allocation4 + $0x7]]  ;;  %770 = vmatpush3.bf16.msra.mxu0 %v841_v1  ;;  %778 = vmatpush3.bf16.msra.mxu1 %v842_v2  ;;  %v154_v5 = vld [vmem:[#allocation5] sm:$0xff]  ;;  %v846_v17 = vld [vmem:[#allocation11] sm:$0xff]   ;;  %v847_v18 = vld [vmem:[#allocation14 + $0x8] sm:$0xff]  }
  0x95   :  { %771 = vmatprep.subr.bf16.mxu0 %v1103_v0  ;;  %779 = vmatprep.subr.bf16.mxu1 %v1103_v0  ;;  %156 = vst.msk [vmem:[#allocation18] sm:$0xff] %vm155_vm1, %v154_v5  ;;  %v848_v21 = vld [vmem:[#allocation11 + $0x8] sm:$0xff]   ;;  %v850_v22 = vld [vmem:[%s1418_s5] sm:$0xff]   ;;  %v852_v24 = vld [vmem:[%s1418_s5 + $0x8] sm:$0xff]  }
  0x96   :  { %v849_v23 = vld [vmem:[#allocation16] sm:$0xff]   ;;  %v851_v25 = vld [vmem:[#allocation16 + $0x8] sm:$0xff]  }
  0x97   :  { %s159_s30 = scalar_lea.vmem [#allocation8], %s158_s10  ;;  %s165_s23 = scalar_lea.vmem [#allocation8], %s713_s21  ;;  %v853_v26 = vld [vmem:[%s1426_s13] sm:$0xff]   ;;  %v854_v27 = vld [vmem:[%s1426_s13 + $0x8] sm:$0xff]  }
  0x98   :  { %v160_v6 = vld [vmem:[%s159_s30] sm:$0x1]  ;;  %s170_s3 = scalar_lea.vmem [#allocation8], %s714_s8  ;;  %s175_s26 = scalar_lea.vmem [#allocation8], %s715_s17  ;;  %772 = vmatpush3.bf16.msra.mxu0 %v843_v3  ;;  %780 = vmatpush3.bf16.msra.mxu1 %v844_v4 }
  0x99   :  { %v166_v7 = vld [vmem:[%s165_s23] sm:$0x1]  ;;  %162 = vst.msk [vmem:[#allocation2] sm:$0x1] %vm161_vm2, %v160_v6  ;;  %s180_s2 = scalar_lea.vmem [#allocation8], %s716_s25  ;;  %s185_s27 = scalar_lea.vmem [#allocation8], %s1309_s20  ;;  %785 = vmatprep.subr.bf16.mxu0 %v1103_v0  ;;  %793 = vmatprep.subr.bf16.mxu1 %v1103_v0 }
  0x9a   :  { %167 = vst.msk [vmem:[#allocation2 + $0x1] sm:$0x1] %vm161_vm2, %v166_v7  ;;  %v171_v8 = vld [vmem:[%s170_s3] sm:$0x1]  ;;  %s190_s28 = scalar_lea.vmem [#allocation8], %s1311_s22  ;;  %s195_s29 = scalar_lea.vmem [#allocation8], %s1313_s4 }
  0x9b   :  { %v176_v9 = vld [vmem:[%s175_s26] sm:$0x1]  ;;  %172 = vst.msk [vmem:[#allocation2 + $0x2] sm:$0x1] %vm161_vm2, %v171_v8  ;;  %s1434_s17 = sld [smem:[#allocation28_spill]]  ;;  %s1105_s4 = smov [#allocation18]  }
  0x9c   :  { %v181_v10 = vld [vmem:[%s180_s2] sm:$0x1]  ;;  %177 = vst.msk [vmem:[#allocation2 + $0x3] sm:$0x1] %vm161_vm2, %v176_v9  ;;  %v1331_v14 = vld [vmem:[#allocation18] sm:$0xff]  ;;  %s689_s30 = sshll.u32 %s1105_s4, 4  ;;  %s690_s30 = int_to_ptr.vmem [resolvable:$true] %s689_s30 }
  0x9d   :  { %182 = vst.msk [vmem:[#allocation2 + $0x4] sm:$0x1] %vm161_vm2, %v181_v10  ;;  %v186_v11 = vld [vmem:[%s185_s27] sm:$0x1]  ;;  %v201_v16 = vpack.c.bf16 %v1331_v14, %v1331_v14  ;;  %s1033_s23 = scalar_lea.vmem %s690_s30, 128  ;;  %p1038_p4 = scmp.lt.s32.totalorder %s690_s30, %s690_s30 }
  0x9e   :  { %v191_v12 = vld [vmem:[%s190_s28] sm:$0x1]  ;;  %187 = vst.msk [vmem:[#allocation2 + $0x5] sm:$0x1] %vm161_vm2, %v186_v11  ;;  %p1034_p3 = scmp.ne.s32.totalorder %s690_s30, %s1033_s23  ;;  %p1039_p5 = scmp.lt.s32.totalorder %s1033_s23, %s1033_s23 }
  0x9f   :  { %192 = vst.msk [vmem:[#allocation2 + $0x6] sm:$0x1] %vm161_vm2, %v191_v12  ;;  %v196_v13 = vld [vmem:[%s195_s29] sm:$0x1]  ;;  %774 = vmatmul.mubr.msk.bf16.vlgmr.msra.gmra.mrb[0].mxu0 %vm155_vm1, %v201_v16 }
  0xa0   :  { %197 = vst.msk [vmem:[#allocation2 + $0x7] sm:$0x1] %vm161_vm2, %v196_v13  ;;  %786 = vmatpush3.bf16.msra.mxu0 %v845_v15  ;;  %789 = vmatprep.mubr.msk.bf16.mxu0 %vm1104_vm0, %v1103_v0  ;;  %v726_v33 = vld [vmem:[%s1422_s9] ss:$0 sm:$0xff]  ;;  %p1040_p6 = por %p1039_p5, %p1038_p4 }
  0xa1   :  { %787 = vmatprep.subr.bf16.mxu0 %v1103_v0  ;;  %v734_v45 = vld [vmem:[%s1434_s17] ss:$0 sm:$0xff] }
  0xa2   :  { %v740_v62 = vld [vmem:[%s1425_s12] ss:$0 sm:$0xff]  ;;  %p1041_p7 = pnand %p1040_p6, %p1034_p3 }
  0xa3   :  { %v736_v1 = vld [vmem:[%s1424_s11] ss:$0 sm:$0xff] }
  0xa4   :  { %788 = vmatpush3.bf16.msra.mxu0 %v847_v18  ;;  %v744_v15 = vld [vmem:[%s1427_s14] ss:$0 sm:$0xff] }
  0xa5   :  { %801 = vmatprep.subr.bf16.mxu0 %v1103_v0 }
  0xa7   :  { %v198_v19 = vld [vmem:[#allocation2] sm:$0xff]  ;;  %790 = vmatmul.mubr.msk.bf16.vlgmr.msra.gmra.mrb[4].mxu0 %vm155_vm1, %v201_v16 }
  0xa8   :  { %v199_v20 = vpack.c.bf16 %v198_v19, %v198_v19  ;;  %802 = vmatpush3.bf16.msra.mxu0 %v850_v22  ;;  %805 = vmatprep.mubr.msk.bf16.mxu0 %vm1104_vm0, %v1103_v0 }
  0xa9   :  { %803 = vmatprep.subr.bf16.mxu0 %v1103_v0 }
  0xaa   :  { %782 = vmatmul.mubr.msk.bf16.vlgmr.msra.gmra.mrb[0].mxu1 %vm155_vm1, %v199_v20 }
  0xab   :  { %794 = vmatpush3.bf16.msra.mxu1 %v846_v17  ;;  %797 = vmatprep.mubr.msk.bf16.mxu1 %vm1104_vm0, %v1103_v0 }
  0xac   :  { %795 = vmatprep.subr.bf16.mxu1 %v1103_v0  ;;  %804 = vmatpush3.bf16.msra.mxu0 %v852_v24 }
  0xad   :  { %817 = vmatprep.subr.bf16.mxu0 %v1103_v0 }
  0xaf   :  { %796 = vmatpush3.bf16.msra.mxu1 %v848_v21  ;;  %806 = vmatmul.mubr.msk.bf16.vlgmr.msra.gmra.mrb[8].mxu0 %vm155_vm1, %v199_v20 }
  0xb0   :  { %809 = vmatprep.subr.bf16.mxu1 %v1103_v0  ;;  %821 = vmatprep.mubr.msk.bf16.mxu0 %vm1104_vm0, %v1103_v0 }
  0xb1   :  { %818 = vmatpush3.bf16.msra.mxu0 %v853_v26 }
  0xb2   :  { %798 = vmatmul.mubr.msk.bf16.vlgmr.msra.gmra.mrb[4].mxu1 %vm155_vm1, %v199_v20  ;;  %819 = vmatprep.subr.bf16.mxu0 %v1103_v0 }
  0xb3   :  { %810 = vmatpush3.bf16.msra.mxu1 %v849_v23  ;;  %813 = vmatprep.mubr.msk.bf16.mxu1 %vm1104_vm0, %v1103_v0 }
  0xb4   :  { %811 = vmatprep.subr.bf16.mxu1 %v1103_v0 }
  0xb5   :  { %820 = vmatpush3.bf16.msra.mxu0 %v854_v27 }
  0xb7   :  { %812 = vmatpush3.bf16.msra.mxu1 %v851_v25 }
  0xba   :  { %814 = vmatmul.mubr.msk.bf16.vlgmr.msra.gmra.mrb[8].mxu1 %vm155_vm1, %v201_v16 }
 0x172   :  { %v260_v28 = vpop.f32.mrb[0].mxu0 }
 0x173   :  { %v775_v29 = vpop.f32.mrb[1].mxu0 }
 0x174   :  { %v263_v30 = vpop.f32.mrb[2].mxu0 }
 0x175   :  { %v776_v31 = vpop.f32.mrb[3].mxu0 }
 0x17a   :  { %v389_v39 = vpop.f32.mrb[4].mxu0 }
 0x17b   :  { %v791_v41 = vpop.f32.mrb[5].mxu0 }
 0x17c   :  { %v392_v42 = vpop.f32.mrb[6].mxu0 }
 0x17d   :  { %v315_v32 = vpop.f32.mrb[0].mxu1  ;;  %v792_v43 = vpop.f32.mrb[7].mxu0 }
 0x17e   :  { %v316_v34 = vadd.f32 %v315_v32, %v260_v28  ;;  %v783_v35 = vpop.f32.mrb[1].mxu1 }
 0x17f   :  { %v318_v36 = vpop.f32.mrb[2].mxu1 }
 0x180   :  { %v328_v37 = vadd.f32 %v726_v33, %v316_v34  ;;  %v784_v38 = vpop.f32.mrb[3].mxu1 }
 0x182   :  { %v727_v40 = vmul.f32 -1.442695, %v328_v37  ;;  %v518_v51 = vpop.f32.mrb[8].mxu0 }
 0x183   :  { %v807_v53 = vpop.f32.mrb[9].mxu0  ;;  %v519_v3 = vadd.f32 %v736_v1, %v518_v51 }
 0x184   :  { %855 = vpow2.f32 %v727_v40  ;;  %v521_v54 = vpop.f32.mrb[10].mxu0 }
 0x185   :  { %v441_v44 = vpop.f32.mrb[4].mxu1  ;;  %v808_v55 = vpop.f32.mrb[11].mxu0 }
 0x186   :  { %v442_v46 = vadd.f32 %v441_v44, %v389_v39  ;;  %v799_v47 = vpop.f32.mrb[5].mxu1 }
 0x187   :  { %v444_v48 = vpop.f32.mrb[6].mxu1 }
 0x188   :  { %v454_v49 = vadd.f32 %v734_v45, %v442_v46  ;;  %v800_v50 = vpop.f32.mrb[7].mxu1 }
 0x18a   :  { %v735_v52 = vmul.f32 -1.442695, %v454_v49 }
 0x18c   :  { %857 = vpow2.f32 %v735_v52 }
 0x18d   :  { %v581_v56 = vpop.f32.mrb[8].mxu1 }
 0x18e   :  { %v856_v57 = vpop.eup %855  ;;  %v815_v58 = vpop.f32.mrb[9].mxu1  ;;  %v582_v2 = vadd.f32 %v740_v62, %v581_v56 }
 0x18f   :  { %v332_v59 = vadd.f32 1.0, %v856_v57  ;;  %v584_v60 = vpop.f32.mrb[10].mxu1 }
 0x190   :  { %v816_v61 = vpop.f32.mrb[11].mxu1 }
 0x191   :  { %859 = vrcp.f32 %v332_v59 }
 0x196   :  { %v858_v63 = vpop.eup %857 }
 0x197   :  { %v458_v0 = vadd.f32 1.0, %v858_v63 }
 0x199   :  { %861 = vrcp.f32 %v458_v0 }
 0x19b   :  { %v860_v4 = vpop.eup %859 }
 0x19c   :  { %v587_v5 = vmul.f32 %v860_v4, %v582_v2 }
 0x19e   :  { %v588_v6 = vadd.f32 %v587_v5, %v519_v3 }
 0x1a0   :  { %863 = vtanh.f32 %v588_v6 }
 0x1a3   :  { %v862_v7 = vpop.eup %861 }
 0x1a4   :  { %v590_v8 = vsub.f32 1.0, %v862_v7  ;;  %v592_v11 = vmul.f32 %v862_v7, %v1331_v14 }
 0x1aa   :  { %v864_v9 = vpop.eup %863 }
 0x1ab   :  { %v591_v10 = vmul.f32 %v864_v9, %v590_v8 }
 0x1ad   :  { %v593_v12 = vadd.f32 %v592_v11, %v591_v10 }
 0x1af   :  { %v595_v13 = vpack.c.bf16 %v593_v12, %v593_v12  ;;  %594 = vst.msk [vmem:[#allocation18] sm:$0xff] %vm155_vm1, %v593_v12 }
 0x1b1   :  { %822 = vmatmul.mubr.msk.bf16.vlgmr.msra.gmra.mrb[12].mxu0 %vm155_vm1, %v595_v13 }
 0x284   :  { %v656_v16 = vpop.f32.mrb[12].mxu0 }
 0x285   :  { %v657_v17 = vadd.f32 %v744_v15, %v656_v16  ;;  %v823_v18 = vpop.f32.mrb[13].mxu0 }
 0x286   :  { %v659_v19 = vpop.f32.mrb[14].mxu0 }
 0x287   :  { %662 = vmax.xlane.f32.xlu0 %v657_v17  ;;  %v824_v20 = vpop.f32.mrb[15].mxu0 }
 0x314   :  { %v663_v21 = vpop.xlane.xlu0 %662 }
 0x315   :  { %v664_v22 = vsub.f32 %v657_v17, %v663_v21 }
 0x317   :  { %v665_v23 = vmul.f32 1.442695, %v664_v22 }
 0x319   :  { %865 = vpow2.f32 %v665_v23 }
 0x323   :  { %v866_v14 = vpop.eup %865 }
 0x324   :  { %667 = vadd.xlane.f32.xlu0 %v866_v14 }
 0x325   :  { %1044 = shalt.err (!%p1041_p7)
}
 0x326   :  { %s1045_s26 = scalar_lea.hbm %s1429_s16, 128 }
 0x327   :  { %p1046_p8 = scmp.ne.s32.totalorder %s1429_s16, %s1045_s26  ;;  %p1049_p9 = scmp.lt.u32.totalorder %s1045_s26, %s1429_s16 }
 0x329   :  { %p1051_p10 = pnand %p1049_p9, %p1046_p8 }
 0x32b   :  { %1054 = shalt.err (!%p1051_p10)
}
 0x32c   :  { %692 = dma.vmem_to_hbm [thread:$0]  %s690_s30, 128, %s1429_s16, [#allocation19]  }
 0x32d   :  { %s1106_s0 = smov [#allocation17]  }
 0x32e   :  { %s679_s19 = sshll.u32 %s1106_s0, 4  ;;  %s680_s19 = int_to_ptr.vmem [resolvable:$true] %s679_s19 }
 0x32f   :  { %s1055_s5 = scalar_lea.vmem %s680_s19, 128  ;;  %p1060_p12 = scmp.lt.s32.totalorder %s680_s19, %s680_s19 }
 0x330   :  { %p1056_p11 = scmp.ne.s32.totalorder %s680_s19, %s1055_s5  ;;  %p1061_p13 = scmp.lt.s32.totalorder %s1055_s5, %s1055_s5 }
 0x332   :  { %p1062_p0 = por %p1061_p13, %p1060_p12 }
 0x334   :  { %p1063_p1 = pnand %p1062_p0, %p1056_p11 }
 0x3b1   :  { %v668_v24 = vpop.xlane.xlu0 %667 }
 0x3b2   :  { %867 = vlog2.f32 %v668_v24 }
 0x3bc   :  { %v868_v25 = vpop.eup %867 }
 0x3bd   :  { %v670_v26 = vmul.f32 0.6931472, %v868_v25 }
 0x3bf   :  { %v671_v27 = vsub.f32 %v664_v22, %v670_v26 }
 0x3c1   :  { %672 = vst [vmem:[#allocation17] sm:$0xff] %v671_v27 }
 0x3c2   :  { %1066 = shalt.err (!%p1063_p1)
}
 0x3c3   :  { %s1067_s16 = scalar_lea.hbm %s1428_s15, 128 }
 0x3c4   :  { %p1068_p2 = scmp.ne.s32.totalorder %s1428_s15, %s1067_s16  ;;  %p1071_p3 = scmp.lt.u32.totalorder %s1067_s16, %s1428_s15 }
 0x3c6   :  { %p1073_p4 = pnand %p1071_p3, %p1068_p2 }
 0x3c8   :  { %1076 = shalt.err (!%p1073_p4)
}
 0x3c9   :  { %682 = dma.vmem_to_hbm [thread:$0]  %s680_s19, 128, %s1428_s15, [#allocation7]  }
 0x3ca   :  { %1087 = dma.done.wait [#allocation7], 128  }
 0x3cb   :  { %1088 = vsyncadd [#allocation7], 4294967168 }
 0x3cc   :  { %1089 = dma.done.wait [#allocation19], 128  }
 0x3cd   :  { %1090 = vsyncadd [#allocation19], 4294967168 }
 0x3ce   :  { %699 = vsyncpa [#allocation6], 1 }
 0x3cf   :  { %700 = vsyncpa [#allocation9], 1 }
 0x3d0   :  { %701 = vsyncpa [#allocation12], 1 }
 0x3d1   :  { %702 = vsyncpa [#allocation15], 1 }
 0x3d2   :  { %703 = vsyncpa [#allocation7], 1 }
 0x3d3   :  { %704 = vsyncpa [#allocation19], 1 }

</bundles_post_ra>
